<compile_context>
chip_gen: v5e
topology: v5e:2x2
jax: 0.10.0
libtpu: 0.0.40
codegen_flags: <defaults>
</compile_context>

<pallas_src>
import jax
import jax.numpy as jnp
import numpy as np
from jax.experimental import pallas as pl
from jax.experimental.pallas import tpu as pltpu

EPS_WS = 1e-5   # weight-standardization eps (float32 inputs)
EPS_GN = 1e-5   # nn.GroupNorm default eps


# ----------------------------- Pallas kernel --------------------------------
def resnet_block_kernel(x_ref, ss_ref, w1_ref, w2_ref, cp_ref,
                        ohcg_ref, ohgc_ref, a_ref, o_ref):
    TB, L, Ci = x_ref.shape
    Co = w2_ref.shape[1]
    G = ohcg_ref.shape[1]
    R = TB * L
    inv_n = 1.0 / float(L * (Co // G))

    cp = cp_ref[...]                                   # (8, 2*Co) packed params
    b1, bres = cp[0:1, :Co], cp[0:1, Co:]
    g1, be1 = cp[1:2, :Co], cp[1:2, Co:]
    g2, be2 = cp[2:3, :Co], cp[2:3, Co:]
    b2 = cp[3:4, :Co]

    oh_cg = ohcg_ref[...]                              # (Co, G)
    oh_gc = ohgc_ref[...]                              # (G, Co)

    # per-row position inside each sample (conv zero-padding at sample edges)
    li = jax.lax.broadcasted_iota(jnp.int32, (TB, L, 1), 1)
    not_first = (li > 0).reshape(R, 1)
    not_last = (li < (L - 1)).reshape(R, 1)

    def shifted_stack(v):
        # v: (R, C) -> (R, 3*C) = [v(l-1) | v(l) | v(l+1)], zero at sample edges
        vm1 = jnp.where(not_first, pltpu.roll(v, shift=1, axis=0), 0.0)
        vp1 = jnp.where(not_last, pltpu.roll(v, shift=R - 1, axis=0), 0.0)
        return jnp.concatenate([vm1, v, vp1], axis=1)

    def group_norm(y, gamma, beta):
        # y: (R, Co); statistics are per (sample, group)
        pg = jnp.dot(y, oh_cg, preferred_element_type=jnp.float32)        # (R, G)
        pg2 = jnp.dot(y * y, oh_cg, preferred_element_type=jnp.float32)   # (R, G)
        mean_g = jnp.sum(pg.reshape(TB, L, G), axis=1) * inv_n            # (TB, G)
        ex2_g = jnp.sum(pg2.reshape(TB, L, G), axis=1) * inv_n            # (TB, G)
        var_g = ex2_g - mean_g * mean_g
        mean_c = jnp.dot(mean_g, oh_gc, preferred_element_type=jnp.float32)[:, None, :]
        var_c = jnp.dot(var_g, oh_gc, preferred_element_type=jnp.float32)[:, None, :]
        yn = (y.reshape(TB, L, Co) - mean_c) * jax.lax.rsqrt(var_c + EPS_GN)
        return (yn * gamma + beta).reshape(R, Co)

    def prelu(v, a):
        return jnp.where(v > 0, v, a * v)

    x = x_ref[...].reshape(R, Ci)

    # --- block1 conv (weight-standardized k=3) fused with the 1x1 residual ---
    y = jnp.dot(shifted_stack(x), w1_ref[...], preferred_element_type=jnp.float32)
    h = y[:, :Co] + b1                                  # conv1 pre-norm output
    res = y[:, Co:] + bres                              # residual branch

    h = group_norm(h, g1, be1)

    # --- per-sample (scale, shift) from the hoisted time-MLP ---
    ss = ss_ref[...]                                    # (TB, 1, 2*Co)
    scale = ss[:, :, :Co]
    shift = ss[:, :, Co:]
    h = (h.reshape(TB, L, Co) * (scale + 1.0) + shift).reshape(R, Co)
    h = prelu(h, a_ref[0])

    # --- block2 conv (weight-standardized k=3) ---
    h = jnp.dot(shifted_stack(h), w2_ref[...], preferred_element_type=jnp.float32) + b2
    h = group_norm(h, g2, be2)
    h = prelu(h, a_ref[1])

    o_ref[...] = (h + res).reshape(TB, L, Co).astype(o_ref.dtype)


# ----------------------------- wrapper ---------------------------------------
def _standardize_conv_weight(w, eps=EPS_WS):
    # w: (K, Ci, Co); standardize per OUTPUT channel over (K, Ci); unbiased=False
    w = w.astype(jnp.float32)
    mean = jnp.mean(w, axis=(0, 1), keepdims=True)
    var = jnp.mean((w - mean) ** 2, axis=(0, 1), keepdims=True)
    return (w - mean) * jax.lax.rsqrt(var + eps)


def _group_onehots(co, groups):
    ch = np.arange(co)
    oh = (ch[:, None] // (co // groups) == np.arange(groups)[None, :]).astype(np.float32)
    return jnp.asarray(oh), jnp.asarray(oh.T)


def _pick_block_batch(B, L, min_rows=128, max_rows=1024):
    divs = [d for d in range(1, B + 1) if B % d == 0]
    good = [d for d in divs if min_rows <= d * L <= max_rows]
    if good:
        return good[0]                 # smallest block that fills the MXU rows
    fit = [d for d in divs if d * L <= max_rows]
    return fit[-1] if fit else 1


def resnet_block_forward(x_ncl, time_emb, params, *, groups=8, block_batch=None):
    f32 = jnp.float32
    B, Cin, L = x_ncl.shape
    Co = params["b1"].shape[1]
    assert Co % groups == 0, "GroupNorm requires dim_out % groups == 0"

    x = jnp.transpose(x_ncl, (0, 2, 1)).astype(f32)                  # (B, L, Cin)
    # TODO(synk): for small-C / long-L shapes a (C, L)-layout kernel variant would
    # remove these boundary transposes and give lane-dense stores.

    # ---- hoisted, batch-invariant prep (one-time XLA work) ----
    w1n = _standardize_conv_weight(params["w1"])                     # (3, Cin, Co)
    w2n = _standardize_conv_weight(params["w2"])                     # (3, Co, Co)
    w1_flat = w1n.reshape(3 * Cin, Co)
    wres_pad = jnp.concatenate(
        [jnp.zeros((Cin, Co), f32), params["w_res"].astype(f32),
         jnp.zeros((Cin, Co), f32)], axis=0)                         # center tap only
    w1_aug = jnp.concatenate([w1_flat, wres_pad], axis=1)            # (3*Cin, 2*Co)
    w2_flat = w2n.reshape(3 * Co, Co)                                # (3*Co, Co)

    # hoisted time-MLP: PReLU -> Linear -> per-sample (scale | shift)
    t = time_emb.astype(f32)
    t = jnp.where(t > 0, t, params["a_mlp"][0, 0] * t)
    ss = (t @ params["w_mlp"].astype(f32)
          + params["b_mlp"].astype(f32))[:, None, :]                 # (B, 1, 2*Co)

    # per-channel params packed into one (8, 2*Co) tile
    cp = jnp.concatenate([
        jnp.concatenate([params["b1"], params["b_res"]], axis=1),
        jnp.concatenate([params["g1"], params["be1"]], axis=1),
        jnp.concatenate([params["g2"], params["be2"]], axis=1),
        jnp.concatenate([params["b2"], jnp.zeros((1, Co), f32)], axis=1),
        jnp.zeros((4, 2 * Co), f32),
    ], axis=0).astype(f32)

    # PReLU slopes of block1/block2 as SMEM scalars
    a_sc = jnp.concatenate(
        [params["a1"].reshape(1), params["a2"].reshape(1)]).astype(f32)   # (2,)

    oh_cg, oh_gc = _group_onehots(Co, groups)

    TB = block_batch or _pick_block_batch(B, L)
    assert B % TB == 0

    def full(arr):
        nd = arr.ndim
        return pl.BlockSpec(arr.shape, lambda b, _nd=nd: (0,) * _nd)

    # NOTE: matmul operands are kept in f32 to stay within tight tolerance of
    # the PyTorch semantics; cast to bf16 here for 2-4x MXU throughput if
    # accuracy budget allows.
    out = pl.pallas_call(
        resnet_block_kernel,
        out_shape=jax.ShapeDtypeStruct((B, L, Co), f32),
        grid=(B // TB,),
        in_specs=[
            pl.BlockSpec((TB, L, Cin), lambda b: (b, 0, 0)),
            pl.BlockSpec((TB, 1, 2 * Co), lambda b: (b, 0, 0)),
            full(w1_aug), full(w2_flat), full(cp), full(oh_cg), full(oh_gc),
            pl.BlockSpec(memory_space=pltpu.MemorySpace.SMEM),
        ],
        out_specs=pl.BlockSpec((TB, L, Co), lambda b: (b, 0, 0)),
        compiler_params=pltpu.CompilerParams(dimension_semantics=("parallel",)),
    )(x, ss, w1_aug, w2_flat, cp, oh_cg, oh_gc, a_sc)
    return jnp.transpose(out, (0, 2, 1))                             # (B, Co, L)


# ----------------------------- pure-JAX reference -----------------------------
def resnet_block_reference(x_ncl, time_emb, params, *, groups=8):
    f32 = jnp.float32
    x = jnp.transpose(x_ncl, (0, 2, 1)).astype(f32)                  # (B, L, Cin)
    B, L, _ = x.shape
    Co = params["b1"].shape[1]

    t = time_emb.astype(f32)
    t = jnp.where(t > 0, t, params["a_mlp"][0, 0] * t)
    temb = t @ params["w_mlp"] + params["b_mlp"]
    scale, shift = temb[:, :Co], temb[:, Co:]

    def ws_conv3(xb, w, b):
        wn = _standardize_conv_weight(w)
        xp = jnp.pad(xb, ((1, 1), (0, 0)))
        return xp[:-2] @ wn[0] + xp[1:-1] @ wn[1] + xp[2:] @ wn[2] + b

    def gnorm(y, gamma, beta):
        yg = y.reshape(L, groups, Co // groups)
        m = jnp.mean(yg, axis=(0, 2), keepdims=True)
        v = jnp.mean((yg - m) ** 2, axis=(0, 2), keepdims=True)
        return ((yg - m) / jnp.sqrt(v + EPS_GN)).reshape(L, Co) * gamma + beta

    def prelu(v, a):
        return jnp.where(v > 0, v, a * v)

    outs = []
    for b in range(B):
        xb = x[b]
        h = ws_conv3(xb, params["w1"], params["b1"])
        h = gnorm(h, params["g1"], params["be1"])
        h = h * (scale[b][None, :] + 1.0) + shift[b][None, :]
        h = prelu(h, params["a1"][0, 0])
        h = ws_conv3(h, params["w2"], params["b2"])
        h = gnorm(h, params["g2"], params["be2"])
        h = prelu(h, params["a2"][0, 0])
        r = xb @ params["w_res"] + params["b_res"]
        outs.append(h + r)
    return jnp.transpose(jnp.stack(outs, axis=0), (0, 2, 1))


# ----------------------------- parameter init --------------------------------
def init_params(key, dim, dim_out, time_emb_dim):
    ks = jax.random.split(key, 8)
    return {
        # conv weights stored as (K, Cin, Cout)  (torch layout is (Cout, Cin, K))
        "w1": 0.1 * jax.random.normal(ks[0], (3, dim, dim_out), jnp.float32),
        "b1": 0.1 * jax.random.normal(ks[1], (1, dim_out), jnp.float32),
        "g1": jnp.ones((1, dim_out), jnp.float32),
        "be1": jnp.zeros((1, dim_out), jnp.float32),
        "a1": jnp.full((1, 1), 0.25, jnp.float32),       # PReLU default init
        "w2": 0.1 * jax.random.normal(ks[2], (3, dim_out, dim_out), jnp.float32),
        "b2": 0.1 * jax.random.normal(ks[3], (1, dim_out), jnp.float32),
        "g2": jnp.ones((1, dim_out), jnp.float32),
        "be2": jnp.zeros((1, dim_out), jnp.float32),
        "a2": jnp.full((1, 1), 0.25, jnp.float32),
        "a_mlp": jnp.full((1, 1), 0.25, jnp.float32),
        # Linear(time_emb_dim, 2*dim_out), stored transposed for right-multiply
        "w_mlp": 0.1 * jax.random.normal(ks[4], (time_emb_dim, 2 * dim_out), jnp.float32),
        "b_mlp": 0.1 * jax.random.normal(ks[5], (1, 2 * dim_out), jnp.float32),
        # 1x1 residual conv: (Cin, Cout)
        "w_res": 0.1 * jax.random.normal(ks[6], (dim, dim_out), jnp.float32),
        "b_res": 0.1 * jax.random.normal(ks[7], (1, dim_out), jnp.float32),
    }


if __name__ == "__main__":
    B, dim, dim_out, L, Te, groups = 2, 8, 16, 16, 32, 8

    key = jax.random.PRNGKey(0)
    k_x, k_t, k_p = jax.random.split(key, 3)
    x = jax.random.normal(k_x, (B, dim, L), jnp.float32)      # NCL, like torch Conv1d
    time_emb = jax.random.normal(k_t, (B, Te), jnp.float32)
    params = init_params(k_p, dim, dim_out, Te)

    out = jax.block_until_ready(resnet_block_forward(x, time_emb, params, groups=groups))
    assert out.shape == (B, dim_out, L), out.shape

    ref = jax.block_until_ready(resnet_block_reference(x, time_emb, params, groups=groups))
    np.testing.assert_allclose(np.asarray(out), np.asarray(ref), rtol=5e-3, atol=5e-3)

    print("KERNEL_OK")
</pallas_src>

<mosaic_0001>
module attributes {stable_mosaic.version = 11 : i64} {
  func.func @resnet_block_kernel(%arg0: i32, %arg1: memref<2x16x8xf32, #tpu.memory_space<vmem>>, %arg2: memref<2x1x32xf32, #tpu.memory_space<vmem>>, %arg3: memref<24x32xf32, #tpu.memory_space<vmem>>, %arg4: memref<48x16xf32, #tpu.memory_space<vmem>>, %arg5: memref<8x32xf32, #tpu.memory_space<vmem>>, %arg6: memref<16x8xf32, #tpu.memory_space<vmem>>, %arg7: memref<8x16xf32, #tpu.memory_space<vmem>>, %arg8: memref<2xf32, #tpu.memory_space<smem>>, %arg9: memref<2x16x16xf32, #tpu.memory_space<vmem>>) attributes {dimension_semantics = [#tpu.dimension_semantics<parallel>], iteration_bounds = array<i64: 1>, scalar_prefetch = 0 : i64, scratch_operands = 0 : i64, tpu.core_type = #tpu.core_type<tc>, window_params = [{transform_indices = @transform_0, window_bounds = array<i64: 2, 16, 8>}, {transform_indices = @transform_1, window_bounds = array<i64: 2, 1, 32>}, {pipeline_mode = #tpu.pipeline_mode<synchronous>, transform_indices = @transform_2, window_bounds = array<i64: 24, 32>}, {pipeline_mode = #tpu.pipeline_mode<synchronous>, transform_indices = @transform_3, window_bounds = array<i64: 48, 16>}, {pipeline_mode = #tpu.pipeline_mode<synchronous>, transform_indices = @transform_4, window_bounds = array<i64: 8, 32>}, {pipeline_mode = #tpu.pipeline_mode<synchronous>, transform_indices = @transform_5, window_bounds = array<i64: 16, 8>}, {pipeline_mode = #tpu.pipeline_mode<synchronous>, transform_indices = @transform_6, window_bounds = array<i64: 8, 16>}, {transform_indices = @transform_7, window_bounds = array<i64: 2>}, {transform_indices = @transform_8, window_bounds = array<i64: 2, 16, 16>}]} {
    %c0 = arith.constant 0 : index
    %c0_0 = arith.constant 0 : index
    %0 = vector.load %arg5[%c0, %c0_0] : memref<8x32xf32, #tpu.memory_space<vmem>>, vector<8x32xf32>
    %1 = vector.extract_strided_slice %0 {offsets = [0, 0], sizes = [1, 16], strides = [1, 1]} : vector<8x32xf32> to vector<1x16xf32>
    %2 = vector.extract_strided_slice %0 {offsets = [0, 16], sizes = [1, 16], strides = [1, 1]} : vector<8x32xf32> to vector<1x16xf32>
    %3 = vector.extract_strided_slice %0 {offsets = [1, 0], sizes = [1, 16], strides = [1, 1]} : vector<8x32xf32> to vector<1x16xf32>
    %4 = vector.extract_strided_slice %0 {offsets = [1, 16], sizes = [1, 16], strides = [1, 1]} : vector<8x32xf32> to vector<1x16xf32>
    %5 = vector.extract_strided_slice %0 {offsets = [2, 0], sizes = [1, 16], strides = [1, 1]} : vector<8x32xf32> to vector<1x16xf32>
    %6 = vector.extract_strided_slice %0 {offsets = [2, 16], sizes = [1, 16], strides = [1, 1]} : vector<8x32xf32> to vector<1x16xf32>
    %7 = vector.extract_strided_slice %0 {offsets = [3, 0], sizes = [1, 16], strides = [1, 1]} : vector<8x32xf32> to vector<1x16xf32>
    %c0_1 = arith.constant 0 : index
    %c0_2 = arith.constant 0 : index
    %8 = vector.load %arg6[%c0_1, %c0_2] : memref<16x8xf32, #tpu.memory_space<vmem>>, vector<16x8xf32>
    %c0_3 = arith.constant 0 : index
    %c0_4 = arith.constant 0 : index
    %9 = vector.load %arg7[%c0_3, %c0_4] : memref<8x16xf32, #tpu.memory_space<vmem>>, vector<8x16xf32>
    %10 = tpu.iota {dimensions = array<i32: 1>} : vector<2x16x1xi32>
    %c0_i32 = arith.constant 0 : i32
    %11 = vector.broadcast %c0_i32 : i32 to vector<2x16x1xi32>
    %12 = arith.cmpi sgt, %10, %11 : vector<2x16x1xi32>
    %13 = vector.shape_cast %12 : vector<2x16x1xi1> to vector<32x1xi1>
    %c15_i32 = arith.constant 15 : i32
    %14 = vector.broadcast %c15_i32 : i32 to vector<2x16x1xi32>
    %15 = arith.cmpi slt, %10, %14 : vector<2x16x1xi32>
    %16 = vector.shape_cast %15 : vector<2x16x1xi1> to vector<32x1xi1>
    %c0_5 = arith.constant 0 : index
    %c0_6 = arith.constant 0 : index
    %c0_7 = arith.constant 0 : index
    %17 = vector.load %arg1[%c0_5, %c0_6, %c0_7] : memref<2x16x8xf32, #tpu.memory_space<vmem>>, vector<2x16x8xf32>
    %18 = vector.shape_cast %17 : vector<2x16x8xf32> to vector<32x8xf32>
    %c1_i32 = arith.constant 1 : i32
    %19 = tpu.dynamic_rotate %18 by %c1_i32 dim 0 : vector<32x8xf32>, i32 -> vector<32x8xf32>
    %cst = arith.constant 0.000000e+00 : f32
    %20 = vector.shape_cast %13 : vector<32x1xi1> to vector<32x1xi1>
    %21 = vector.broadcast %20 : vector<32x1xi1> to vector<32x8xi1>
    %22 = vector.broadcast %cst : f32 to vector<32x8xf32>
    %23 = arith.select %21, %19, %22 : vector<32x8xi1>, vector<32x8xf32>
    %c31_i32 = arith.constant 31 : i32
    %24 = tpu.dynamic_rotate %18 by %c31_i32 dim 0 : vector<32x8xf32>, i32 -> vector<32x8xf32>
    %cst_8 = arith.constant 0.000000e+00 : f32
    %25 = vector.shape_cast %16 : vector<32x1xi1> to vector<32x1xi1>
    %26 = vector.broadcast %25 : vector<32x1xi1> to vector<32x8xi1>
    %27 = vector.broadcast %cst_8 : f32 to vector<32x8xf32>
    %28 = arith.select %26, %24, %27 : vector<32x8xi1>, vector<32x8xf32>
    %29 = tpu.concatenate %23, %18, %28 in 1 : vector<32x8xf32>, vector<32x8xf32>, vector<32x8xf32> -> vector<32x24xf32>
    %c0_9 = arith.constant 0 : index
    %c0_10 = arith.constant 0 : index
    %30 = vector.load %arg3[%c0_9, %c0_10] : memref<24x32xf32, #tpu.memory_space<vmem>>, vector<24x32xf32>
    %cst_11 = arith.constant dense<0.000000e+00> : vector<32x32xf32>
    %31 = tpu.matmul %29, %30, %cst_11 {dimension_numbers = #tpu.dot_dimension_numbers<[1], [0], [0], [1], [0, 0, 1, 1], [], []>} : vector<32x24xf32>, vector<24x32xf32>, vector<32x32xf32> -> vector<32x32xf32>
    %32 = vector.extract_strided_slice %31 {offsets = [0, 0], sizes = [32, 16], strides = [1, 1]} : vector<32x32xf32> to vector<32x16xf32>
    %33 = vector.broadcast %1 : vector<1x16xf32> to vector<32x16xf32>
    %34 = arith.addf %32, %33 : vector<32x16xf32>
    %35 = vector.extract_strided_slice %31 {offsets = [0, 16], sizes = [32, 16], strides = [1, 1]} : vector<32x32xf32> to vector<32x16xf32>
    %36 = vector.broadcast %2 : vector<1x16xf32> to vector<32x16xf32>
    %37 = arith.addf %35, %36 : vector<32x16xf32>
    %cst_12 = arith.constant dense<0.000000e+00> : vector<32x8xf32>
    %38 = tpu.matmul %34, %8, %cst_12 {dimension_numbers = #tpu.dot_dimension_numbers<[1], [0], [0], [1], [0, 0, 1, 1], [], []>} : vector<32x16xf32>, vector<16x8xf32>, vector<32x8xf32> -> vector<32x8xf32>
    %39 = arith.mulf %34, %34 : vector<32x16xf32>
    %cst_13 = arith.constant dense<0.000000e+00> : vector<32x8xf32>
    %40 = tpu.matmul %39, %8, %cst_13 {dimension_numbers = #tpu.dot_dimension_numbers<[1], [0], [0], [1], [0, 0, 1, 1], [], []>} : vector<32x16xf32>, vector<16x8xf32>, vector<32x8xf32> -> vector<32x8xf32>
    %41 = vector.shape_cast %38 : vector<32x8xf32> to vector<2x16x8xf32>
    %cst_14 = arith.constant dense<0.000000e+00> : vector<2x8xf32>
    %42 = vector.multi_reduction <add>, %41, %cst_14 [1] : vector<2x16x8xf32> to vector<2x8xf32>
    %cst_15 = arith.constant 3.125000e-02 : f32
    %43 = vector.broadcast %cst_15 : f32 to vector<2x8xf32>
    %44 = arith.mulf %42, %43 : vector<2x8xf32>
    %45 = vector.shape_cast %40 : vector<32x8xf32> to vector<2x16x8xf32>
    %cst_16 = arith.constant dense<0.000000e+00> : vector<2x8xf32>
    %46 = vector.multi_reduction <add>, %45, %cst_16 [1] : vector<2x16x8xf32> to vector<2x8xf32>
    %cst_17 = arith.constant 3.125000e-02 : f32
    %47 = vector.broadcast %cst_17 : f32 to vector<2x8xf32>
    %48 = arith.mulf %46, %47 : vector<2x8xf32>
    %49 = arith.mulf %44, %44 : vector<2x8xf32>
    %50 = arith.subf %48, %49 : vector<2x8xf32>
    %cst_18 = arith.constant dense<0.000000e+00> : vector<2x16xf32>
    %51 = tpu.matmul %44, %9, %cst_18 {dimension_numbers = #tpu.dot_dimension_numbers<[1], [0], [0], [1], [0, 0, 1, 1], [], []>} : vector<2x8xf32>, vector<8x16xf32>, vector<2x16xf32> -> vector<2x16xf32>
    %52 = vector.shape_cast %51 : vector<2x16xf32> to vector<2x1x16xf32>
    %cst_19 = arith.constant dense<0.000000e+00> : vector<2x16xf32>
    %53 = tpu.matmul %50, %9, %cst_19 {dimension_numbers = #tpu.dot_dimension_numbers<[1], [0], [0], [1], [0, 0, 1, 1], [], []>} : vector<2x8xf32>, vector<8x16xf32>, vector<2x16xf32> -> vector<2x16xf32>
    %54 = vector.shape_cast %53 : vector<2x16xf32> to vector<2x1x16xf32>
    %55 = vector.shape_cast %34 : vector<32x16xf32> to vector<2x16x16xf32>
    %56 = vector.broadcast %52 : vector<2x1x16xf32> to vector<2x16x16xf32>
    %57 = arith.subf %55, %56 : vector<2x16x16xf32>
    %cst_20 = arith.constant 9.99999974E-6 : f32
    %58 = vector.broadcast %cst_20 : f32 to vector<2x1x16xf32>
    %59 = arith.addf %54, %58 : vector<2x1x16xf32>
    %60 = math.rsqrt %59 : vector<2x1x16xf32>
    %61 = vector.broadcast %60 : vector<2x1x16xf32> to vector<2x16x16xf32>
    %62 = arith.mulf %57, %61 : vector<2x16x16xf32>
    %63 = vector.shape_cast %3 : vector<1x16xf32> to vector<1x1x16xf32>
    %64 = vector.broadcast %63 : vector<1x1x16xf32> to vector<2x16x16xf32>
    %65 = arith.mulf %62, %64 : vector<2x16x16xf32>
    %66 = vector.shape_cast %4 : vector<1x16xf32> to vector<1x1x16xf32>
    %67 = vector.broadcast %66 : vector<1x1x16xf32> to vector<2x16x16xf32>
    %68 = arith.addf %65, %67 : vector<2x16x16xf32>
    %69 = vector.shape_cast %68 : vector<2x16x16xf32> to vector<32x16xf32>
    %c0_21 = arith.constant 0 : index
    %c0_22 = arith.constant 0 : index
    %c0_23 = arith.constant 0 : index
    %70 = vector.load %arg2[%c0_21, %c0_22, %c0_23] : memref<2x1x32xf32, #tpu.memory_space<vmem>>, vector<2x1x32xf32>
    %71 = vector.extract_strided_slice %70 {offsets = [0, 0, 0], sizes = [2, 1, 16], strides = [1, 1, 1]} : vector<2x1x32xf32> to vector<2x1x16xf32>
    %72 = vector.extract_strided_slice %70 {offsets = [0, 0, 16], sizes = [2, 1, 16], strides = [1, 1, 1]} : vector<2x1x32xf32> to vector<2x1x16xf32>
    %73 = vector.shape_cast %69 : vector<32x16xf32> to vector<2x16x16xf32>
    %cst_24 = arith.constant 1.000000e+00 : f32
    %74 = vector.broadcast %cst_24 : f32 to vector<2x1x16xf32>
    %75 = arith.addf %71, %74 : vector<2x1x16xf32>
    %76 = vector.broadcast %75 : vector<2x1x16xf32> to vector<2x16x16xf32>
    %77 = arith.mulf %73, %76 : vector<2x16x16xf32>
    %78 = vector.broadcast %72 : vector<2x1x16xf32> to vector<2x16x16xf32>
    %79 = arith.addf %77, %78 : vector<2x16x16xf32>
    %80 = vector.shape_cast %79 : vector<2x16x16xf32> to vector<32x16xf32>
    %c0_25 = arith.constant 0 : index
    %81 = memref.load %arg8[%c0_25] : memref<2xf32, #tpu.memory_space<smem>>
    %cst_26 = arith.constant 0.000000e+00 : f32
    %82 = vector.broadcast %cst_26 : f32 to vector<32x16xf32>
    %83 = arith.cmpf ogt, %80, %82 : vector<32x16xf32>
    %84 = vector.broadcast %81 : f32 to vector<32x16xf32>
    %85 = arith.mulf %84, %80 : vector<32x16xf32>
    %86 = arith.select %83, %80, %85 : vector<32x16xi1>, vector<32x16xf32>
    %c1_i32_27 = arith.constant 1 : i32
    %87 = tpu.dynamic_rotate %86 by %c1_i32_27 dim 0 : vector<32x16xf32>, i32 -> vector<32x16xf32>
    %cst_28 = arith.constant 0.000000e+00 : f32
    %88 = vector.shape_cast %13 : vector<32x1xi1> to vector<32x1xi1>
    %89 = vector.broadcast %88 : vector<32x1xi1> to vector<32x16xi1>
    %90 = vector.broadcast %cst_28 : f32 to vector<32x16xf32>
    %91 = arith.select %89, %87, %90 : vector<32x16xi1>, vector<32x16xf32>
    %c31_i32_29 = arith.constant 31 : i32
    %92 = tpu.dynamic_rotate %86 by %c31_i32_29 dim 0 : vector<32x16xf32>, i32 -> vector<32x16xf32>
    %cst_30 = arith.constant 0.000000e+00 : f32
    %93 = vector.shape_cast %16 : vector<32x1xi1> to vector<32x1xi1>
    %94 = vector.broadcast %93 : vector<32x1xi1> to vector<32x16xi1>
    %95 = vector.broadcast %cst_30 : f32 to vector<32x16xf32>
    %96 = arith.select %94, %92, %95 : vector<32x16xi1>, vector<32x16xf32>
    %97 = tpu.concatenate %91, %86, %96 in 1 : vector<32x16xf32>, vector<32x16xf32>, vector<32x16xf32> -> vector<32x48xf32>
    %c0_31 = arith.constant 0 : index
    %c0_32 = arith.constant 0 : index
    %98 = vector.load %arg4[%c0_31, %c0_32] : memref<48x16xf32, #tpu.memory_space<vmem>>, vector<48x16xf32>
    %cst_33 = arith.constant dense<0.000000e+00> : vector<32x16xf32>
    %99 = tpu.matmul %97, %98, %cst_33 {dimension_numbers = #tpu.dot_dimension_numbers<[1], [0], [0], [1], [0, 0, 1, 1], [], []>} : vector<32x48xf32>, vector<48x16xf32>, vector<32x16xf32> -> vector<32x16xf32>
    %100 = vector.broadcast %7 : vector<1x16xf32> to vector<32x16xf32>
    %101 = arith.addf %99, %100 : vector<32x16xf32>
    %cst_34 = arith.constant dense<0.000000e+00> : vector<32x8xf32>
    %102 = tpu.matmul %101, %8, %cst_34 {dimension_numbers = #tpu.dot_dimension_numbers<[1], [0], [0], [1], [0, 0, 1, 1], [], []>} : vector<32x16xf32>, vector<16x8xf32>, vector<32x8xf32> -> vector<32x8xf32>
    %103 = arith.mulf %101, %101 : vector<32x16xf32>
    %cst_35 = arith.constant dense<0.000000e+00> : vector<32x8xf32>
    %104 = tpu.matmul %103, %8, %cst_35 {dimension_numbers = #tpu.dot_dimension_numbers<[1], [0], [0], [1], [0, 0, 1, 1], [], []>} : vector<32x16xf32>, vector<16x8xf32>, vector<32x8xf32> -> vector<32x8xf32>
    %105 = vector.shape_cast %102 : vector<32x8xf32> to vector<2x16x8xf32>
    %cst_36 = arith.constant dense<0.000000e+00> : vector<2x8xf32>
    %106 = vector.multi_reduction <add>, %105, %cst_36 [1] : vector<2x16x8xf32> to vector<2x8xf32>
    %cst_37 = arith.constant 3.125000e-02 : f32
    %107 = vector.broadcast %cst_37 : f32 to vector<2x8xf32>
    %108 = arith.mulf %106, %107 : vector<2x8xf32>
    %109 = vector.shape_cast %104 : vector<32x8xf32> to vector<2x16x8xf32>
    %cst_38 = arith.constant dense<0.000000e+00> : vector<2x8xf32>
    %110 = vector.multi_reduction <add>, %109, %cst_38 [1] : vector<2x16x8xf32> to vector<2x8xf32>
    %cst_39 = arith.constant 3.125000e-02 : f32
    %111 = vector.broadcast %cst_39 : f32 to vector<2x8xf32>
    %112 = arith.mulf %110, %111 : vector<2x8xf32>
    %113 = arith.mulf %108, %108 : vector<2x8xf32>
    %114 = arith.subf %112, %113 : vector<2x8xf32>
    %cst_40 = arith.constant dense<0.000000e+00> : vector<2x16xf32>
    %115 = tpu.matmul %108, %9, %cst_40 {dimension_numbers = #tpu.dot_dimension_numbers<[1], [0], [0], [1], [0, 0, 1, 1], [], []>} : vector<2x8xf32>, vector<8x16xf32>, vector<2x16xf32> -> vector<2x16xf32>
    %116 = vector.shape_cast %115 : vector<2x16xf32> to vector<2x1x16xf32>
    %cst_41 = arith.constant dense<0.000000e+00> : vector<2x16xf32>
    %117 = tpu.matmul %114, %9, %cst_41 {dimension_numbers = #tpu.dot_dimension_numbers<[1], [0], [0], [1], [0, 0, 1, 1], [], []>} : vector<2x8xf32>, vector<8x16xf32>, vector<2x16xf32> -> vector<2x16xf32>
    %118 = vector.shape_cast %117 : vector<2x16xf32> to vector<2x1x16xf32>
    %119 = vector.shape_cast %101 : vector<32x16xf32> to vector<2x16x16xf32>
    %120 = vector.broadcast %116 : vector<2x1x16xf32> to vector<2x16x16xf32>
    %121 = arith.subf %119, %120 : vector<2x16x16xf32>
    %cst_42 = arith.constant 9.99999974E-6 : f32
    %122 = vector.broadcast %cst_42 : f32 to vector<2x1x16xf32>
    %123 = arith.addf %118, %122 : vector<2x1x16xf32>
    %124 = math.rsqrt %123 : vector<2x1x16xf32>
    %125 = vector.broadcast %124 : vector<2x1x16xf32> to vector<2x16x16xf32>
    %126 = arith.mulf %121, %125 : vector<2x16x16xf32>
    %127 = vector.shape_cast %5 : vector<1x16xf32> to vector<1x1x16xf32>
    %128 = vector.broadcast %127 : vector<1x1x16xf32> to vector<2x16x16xf32>
    %129 = arith.mulf %126, %128 : vector<2x16x16xf32>
    %130 = vector.shape_cast %6 : vector<1x16xf32> to vector<1x1x16xf32>
    %131 = vector.broadcast %130 : vector<1x1x16xf32> to vector<2x16x16xf32>
    %132 = arith.addf %129, %131 : vector<2x16x16xf32>
    %133 = vector.shape_cast %132 : vector<2x16x16xf32> to vector<32x16xf32>
    %c1 = arith.constant 1 : index
    %134 = memref.load %arg8[%c1] : memref<2xf32, #tpu.memory_space<smem>>
    %cst_43 = arith.constant 0.000000e+00 : f32
    %135 = vector.broadcast %cst_43 : f32 to vector<32x16xf32>
    %136 = arith.cmpf ogt, %133, %135 : vector<32x16xf32>
    %137 = vector.broadcast %134 : f32 to vector<32x16xf32>
    %138 = arith.mulf %137, %133 : vector<32x16xf32>
    %139 = arith.select %136, %133, %138 : vector<32x16xi1>, vector<32x16xf32>
    %140 = arith.addf %139, %37 : vector<32x16xf32>
    %141 = vector.shape_cast %140 : vector<32x16xf32> to vector<2x16x16xf32>
    %c0_44 = arith.constant 0 : index
    %c0_45 = arith.constant 0 : index
    %c0_46 = arith.constant 0 : index
    %142 = vector.load %arg9[%c0_44, %c0_45, %c0_46] : memref<2x16x16xf32, #tpu.memory_space<vmem>>, vector<2x16x16xf32>
    tpu.vector_store %arg9[%c0_44, %c0_45, %c0_46], %141 {strides = array<i32>} : memref<2x16x16xf32, #tpu.memory_space<vmem>>, vector<2x16x16xf32>,
    return
  }
  func.func @transform_0(%arg0: i32) -> (i32, i32, i32) {
    %c0_i32 = arith.constant 0 : i32
    %c0_i32_0 = arith.constant 0 : i32
    %c0_i32_1 = arith.constant 0 : i32
    return %arg0, %c0_i32, %c0_i32_0 : i32, i32, i32
  }
  func.func @transform_1(%arg0: i32) -> (i32, i32, i32) {
    %c0_i32 = arith.constant 0 : i32
    %c0_i32_0 = arith.constant 0 : i32
    %c0_i32_1 = arith.constant 0 : i32
    return %arg0, %c0_i32, %c0_i32_0 : i32, i32, i32
  }
  func.func @transform_2(%arg0: i32) -> (i32, i32) {
    %c0_i32 = arith.constant 0 : i32
    %c0_i32_0 = arith.constant 0 : i32
    %c0_i32_1 = arith.constant 0 : i32
    return %c0_i32, %c0_i32_0 : i32, i32
  }
  func.func @transform_3(%arg0: i32) -> (i32, i32) {
    %c0_i32 = arith.constant 0 : i32
    %c0_i32_0 = arith.constant 0 : i32
    %c0_i32_1 = arith.constant 0 : i32
    return %c0_i32, %c0_i32_0 : i32, i32
  }
  func.func @transform_4(%arg0: i32) -> (i32, i32) {
    %c0_i32 = arith.constant 0 : i32
    %c0_i32_0 = arith.constant 0 : i32
    %c0_i32_1 = arith.constant 0 : i32
    return %c0_i32, %c0_i32_0 : i32, i32
  }
  func.func @transform_5(%arg0: i32) -> (i32, i32) {
    %c0_i32 = arith.constant 0 : i32
    %c0_i32_0 = arith.constant 0 : i32
    %c0_i32_1 = arith.constant 0 : i32
    return %c0_i32, %c0_i32_0 : i32, i32
  }
  func.func @transform_6(%arg0: i32) -> (i32, i32) {
    %c0_i32 = arith.constant 0 : i32
    %c0_i32_0 = arith.constant 0 : i32
    %c0_i32_1 = arith.constant 0 : i32
    return %c0_i32, %c0_i32_0 : i32, i32
  }
  func.func @transform_7(%arg0: i32) -> i32 {
    %c0_i32 = arith.constant 0 : i32
    %c0_i32_0 = arith.constant 0 : i32
    return %c0_i32 : i32
  }
  func.func @transform_8(%arg0: i32) -> (i32, i32, i32) {
    %c0_i32 = arith.constant 0 : i32
    %c0_i32_0 = arith.constant 0 : i32
    %c0_i32_1 = arith.constant 0 : i32
    return %arg0, %c0_i32, %c0_i32_0 : i32, i32, i32
  }
}

</mosaic_0001>

<bundles_post_ra>
// kernel: tpu_custom_call.1
= control target key start
LH: loop header
LB: loop body
LE: loop exit
PB: predicated region body
PF: predicated region fallthrough
CT: control target
= control target key end

     0   :  { %13 = vsyncpa [#allocation4], 0  ;;  %s1300_s0 = inlined_call_operand.vmem [shape: f32[2,16,8], index: 0, kind: input, shape index: {}]   ;;  %s1301_s1 = inlined_call_operand.vmem [shape: f32[2,1,32], index: 1, kind: input, shape index: {}]   ;;  %s1302_s2 = inlined_call_operand.vmem [shape: f32[24,32], index: 2, kind: input, shape index: {}]   ;;  %s1303_s3 = inlined_call_operand.vmem [shape: f32[48,16], index: 3, kind: input, shape index: {}]   ;;  %s1304_s4 = inlined_call_operand.vmem [shape: f32[8,32], index: 4, kind: input, shape index: {}]   ;;  %s1305_s5 = inlined_call_operand.vmem [shape: f32[16,8], index: 5, kind: input, shape index: {}]   ;;  %s1306_s6 = inlined_call_operand.vmem [shape: f32[8,16], index: 6, kind: input, shape index: {}]   ;;  %s1307_s7 = inlined_call_operand.vmem [shape: f32[2], index: 7, kind: input, shape index: {}]   ;;  %s1308_s8 = inlined_call_operand.hbm [shape: f32[2,16,16], index: 8, kind: output, shape index: {}]  }
   0x1   :  { %14 = vsyncpa [#allocation3], 0  ;;  %s34_s29 = sshll.u32 %s1307_s7, 4  ;;  %s956_s30 = smov [#allocation2]   ;;  %s35_s29 = int_to_ptr.vmem [resolvable:$true] %s34_s29 }
   0x2   :  { %37 = dma.vmem_to_smem %s35_s29, 16, %s956_s30, [#allocation4]  }
   0x3   :  { %952 = dma.done.wait [#allocation4], 16  }
   0x4   :  { %953 = vsyncadd [#allocation4], 4294967280 }
   0x5   :  { %42 = sfence }
   0x6   :  { %v54_v0 = vld [vmem:[%s1300_s0] sm:$0xff]  ;;  %v55_v1 = vld [vmem:[%s1300_s0 + $0x8] sm:$0xff]  ;;  %v47_v2 = vlaneseq  ;;  %v1020_v3 = vld [vmem:[%s1300_s0 + $0x10] sm:$0xff]  ;;  %s957_s7 = smov 8   ;;  %vm124_vm4 = vcmask 64512   ;;  %vm129_vm5 = vcmask 130048  }
   0x7   :  { %96 = vrot.lane.b32.xlu0 %v54_v0, %s957_s7  ;;  %98 = vrot.lane.b32.xlu1 %v55_v1, %s957_s7  ;;  %v76_v4 = vrot.slane %v55_v1, 1  ;;  %v75_v5 = vrot.slane %v54_v0, 1  ;;  %v77_v7 = vrot.slane %v1020_v3, 1  ;;  %v57_v8 = vld [vmem:[%s1300_s0 + $0x18] sm:$0xff]  ;;  %s958_s0 = smov 16   ;;  %v58_v17 = vrot.slane %v54_v0, 7 }
   0x8   :  { %v1024_v6 = vshrl.u32 %v47_v2, 7  ;;  %100 = vrot.lane.b32.xlu2 %v1020_v3, %s957_s7  ;;  %v78_v11 = vrot.slane %v57_v8, 1  ;;  %v61_v18 = vrot.slane %v57_v8, 7  ;;  %v59_v19 = vrot.slane %v55_v1, 7  ;;  %v136_v22 = vld [vmem:[%s1302_s2 + $0x10] sm:$0xff]  ;;  %v135_v23 = vld [vmem:[%s1302_s2 + $0x8] sm:$0xff] }
   0x9   :  { %163 = vmatpush.msra.mxu0 %v136_v22  ;;  %v134_v24 = vld [vmem:[%s1302_s2] sm:$0xff]  ;;  %vm137_vm6 = vcmask 195584   ;;  %v60_v32 = vrot.slane %v1020_v3, 7  ;;  %v45_v46 = vld [vmem:[%s1305_s5 + $0x8] sm:$0xff]  ;;  %s959_s9 = smov 112   ;;  %vm316_vm7 = vcmask 1041409  }
   0xa   :  { %vm79_vm0 = vcmp.lt.s32.totalorder %v1024_v6, 7  ;;  %v1034_v9 = vadd.s32 8, %v1024_v6  ;;  %vm62_vm2 = vcmp.lt.s32.totalorder %v1024_v6, 1  ;;  %vm50_vm3 = vcmp.gt.s32.totalorder %v1024_v6, 0  ;;  %210 = vmatpush.msra.mxu1 %v45_v46  ;;  %255 = vmatpush.msra.mxu2 %v45_v46  ;;  %v44_v47 = vld [vmem:[%s1305_s5] sm:$0xff]  ;;  %s451_s14 = sld [smem:[#allocation2]] }
   0xb   :  { %v81_v10 = vsel %vm79_vm0, %v76_v4, %v77_v7  ;;  %v82_v12 = vsel %vm79_vm0, %v75_v5, %v76_v4  ;;  %v80_v14 = vsel %vm79_vm0, %v77_v7, %v78_v11  ;;  %v83_v15 = vsel %vm79_vm0, %v78_v11, %v75_v5  ;;  %164 = vmatpush.msra.mxu0 %v135_v23  ;;  %v1099_v48 = vld [vmem:[%s1304_s4] sm:$0xff]  ;;  %s961_s25 = smov [#allocation5]   ;;  %s857_s5 = sshll.u32 %s1308_s8, 4  ;;  %s858_s5 = int_to_ptr.hbm [resolvable:$true] %s857_s5 }
   0xc   :  { %vm53_vm1 = vcmp.lt.s32.totalorder %v1034_v9, 15  ;;  %v66_v20 = vsel %vm62_vm2, %v61_v18, %v58_v17  ;;  %v65_v21 = vsel %vm62_vm2, %v58_v17, %v59_v19  ;;  %v64_v35 = vsel %vm62_vm2, %v59_v19, %v60_v32  ;;  %211 = vmatpush.msra.mxu1 %v44_v47  ;;  %256 = vmatpush.msra.mxu2 %v44_v47  ;;  %v46_v2 = vld [vmem:[%s1306_s6] sm:$0xff]  ;;  %s855_s26 = sshll.u32 %s961_s25, 4  ;;  %s962_s28 = smov 128   ;;  %s856_s26 = int_to_ptr.vmem [resolvable:$true] %s855_s26 }
   0xd   :  { %v89_v13 = vsel %vm53_vm1, %v81_v10, 0.0  ;;  %v91_v16 = vsel %vm53_vm1, %v83_v15, 0.0  ;;  %165 = vmatpush.msra.mxu0 %v134_v24  ;;  %v71_v27 = vsel %vm50_vm3, %v66_v20, 0.0  ;;  %v73_v37 = vsel %vm50_vm3, %v64_v35, 0.0  ;;  %335 = vmatpush.msra.mxu3 %v46_v2  ;;  %v534_v9 = vld [vmem:[%s1303_s3 + $0x20] sm:$0xff] }
   0xe   :  { %v63_v42 = vsel %vm62_vm2, %v60_v32, %v61_v18  ;;  %605 = vmatpush.msrb.mxu1 %v45_v46  ;;  %650 = vmatpush.msrb.mxu2 %v45_v46  ;;  %v179_v49 = vperm.slane %v1099_v48, 0  ;;  %v1145_v17 = vperm.slane %v1099_v48, 1 }
   0xf   :  { %112 = vrot.lane.b32.xlu0 %v82_v12, %s958_s0  ;;  %114 = vrot.lane.b32.xlu1 %v89_v13, %s958_s0 }
  0x10   :  { %116 = vrot.lane.b32.xlu2 %v80_v14, %s958_s0  ;;  %606 = vmatpush.msrb.mxu1 %v44_v47  ;;  %v906_v14 = vld [vmem:[%s1301_s1] ss:$0 sm:$0xff] }
  0x11   :  { %651 = vmatpush.msrb.mxu2 %v44_v47  ;;  %729 = vmatpush.msrb.mxu0 %v46_v2 }
  0x12   :  { %362 = vmatpush.msrb.mxu3 %v46_v2 }
  0x17   :  { %102 = vrot.lane.b32.xlu0 %v57_v8, %s957_s7  ;;  %118 = vrot.lane.b32.xlu1 %v91_v16, %s958_s0  ;;  %v907_v16 = vld [vmem:[%s1301_s1 + $0x1] ss:$0 sm:$0xff] }
  0x18   :  { %416 = vrot.lane.b32.xlu2 %v1145_v17, %s959_s9 }
  0x1f   :  { %441 = vrot.lane.b32.xlu0 %v906_v14, %s959_s9  ;;  %443 = vrot.lane.b32.xlu1 %v907_v16, %s959_s9  ;;  %v423_v16 = vld [vmem:[%s1301_s1] sm:$0x1] }
  0x62   :  { %v101_v31 = vpop.permute.xlu2 %100 }
  0x63   :  { %v127_v38 = vsel %vm124_vm4, %v73_v37, %v101_v31 }
  0x6a   :  { %v117_v39 = vpop.permute.xlu2 %116 }
  0x6b   :  { %v132_v40 = vsel %vm129_vm5, %v127_v38, %v117_v39 }
  0x79   :  { %v97_v25 = vpop.permute.xlu0 %96  ;;  %v99_v26 = vpop.permute.xlu1 %98 }
  0x7a   :  { %v125_v28 = vsel %vm124_vm4, %v71_v27, %v97_v25  ;;  %v126_v33 = vsel %vm124_vm4, %v65_v21, %v99_v26 }
  0x81   :  { %v113_v29 = vpop.permute.xlu0 %112  ;;  %v115_v34 = vpop.permute.xlu1 %114 }
  0x82   :  { %v130_v30 = vsel %vm129_vm5, %v125_v28, %v113_v29  ;;  %v131_v36 = vsel %vm129_vm5, %v126_v33, %v115_v34 }
  0x83   :  { %870 = vmatmul.msk.f32.vlgmr.msra.gmra.mxu0 %vm137_vm6, %v130_v30 }
  0x84   :  { %756 = vmatpush.msra.mxu0 %v46_v2 }
  0x89   :  { %v103_v41 = vpop.permute.xlu0 %102  ;;  %v119_v44 = vpop.permute.xlu1 %118 }
  0x8a   :  { %v128_v43 = vsel %vm124_vm4, %v63_v42, %v103_v41 }
  0x8b   :  { %871 = vmatmul.msk.f32.gmra.mxu0 %vm137_vm6, %v131_v36  ;;  %v133_v45 = vsel %vm129_vm5, %v128_v43, %v119_v44 }
  0x93   :  { %872 = vmatmul.msk.f32.gmra.mxu0 %vm137_vm6, %v132_v40 }
  0x9b   :  { %873 = vmatmul.msk.f32.gmra.mxu0 %vm137_vm6, %v133_v45 }
 0x100   :  { %v167_v50 = vpop.f32.mrf.mxu0 }
 0x101   :  { %v1102_v51 = vadd.f32 %v179_v49, %v167_v50 }
 0x103   :  { %874 = vmatmul.msk.f32.vlgmr.msra.gmra.mxu1 %vm129_vm5, %v1102_v51  ;;  %v225_v52 = vmul.f32 %v1102_v51, %v1102_v51 }
 0x105   :  { %878 = vmatmul.msk.f32.vlgmr.msra.gmra.mxu2 %vm129_vm5, %v225_v52 }
 0x108   :  { %v170_v53 = vpop.f32.mrf.mxu0 }
 0x109   :  { %v1109_v54 = vadd.f32 %v179_v49, %v170_v53 }
 0x10b   :  { %875 = vmatmul.msk.f32.gmra.mxu1 %vm129_vm5, %v1109_v54  ;;  %v226_v55 = vmul.f32 %v1109_v54, %v1109_v54 }
 0x10d   :  { %879 = vmatmul.msk.f32.gmra.mxu2 %vm129_vm5, %v226_v55 }
 0x110   :  { %v173_v56 = vpop.f32.mrf.mxu0 }
 0x111   :  { %v1116_v57 = vadd.f32 %v179_v49, %v173_v56 }
 0x113   :  { %876 = vmatmul.msk.f32.gmra.mxu1 %vm129_vm5, %v1116_v57  ;;  %v227_v58 = vmul.f32 %v1116_v57, %v1116_v57 }
 0x115   :  { %880 = vmatmul.msk.f32.gmra.mxu2 %vm129_vm5, %v227_v58 }
 0x118   :  { %v176_v59 = vpop.f32.mrf.mxu0 }
 0x119   :  { %v1123_v60 = vadd.f32 %v179_v49, %v176_v59 }
 0x11b   :  { %877 = vmatmul.msk.f32.gmra.mxu1 %vm129_vm5, %v1123_v60  ;;  %v228_v61 = vmul.f32 %v1123_v60, %v1123_v60 }
 0x11d   :  { %881 = vmatmul.msk.f32.gmra.mxu2 %vm129_vm5, %v228_v61 }
 0x180   :  { %v213_v62 = vpop.f32.mrf.mxu1 }
 0x181   :  { %v270_v3 = vsel %vm124_vm4, %v213_v62, 0.0 }
 0x188   :  { %v216_v63 = vpop.f32.mrf.mxu1  ;;  %v258_v0 = vpop.f32.mrf.mxu2 }
 0x189   :  { %v271_v1 = vsel %vm124_vm4, %v216_v63, 0.0  ;;  %v290_v10 = vsel %vm124_vm4, %v258_v0, 0.0 }
 0x18a   :  { %v272_v4 = vadd.f32 %v271_v1, %v270_v3 }
 0x18c   :  { %v273_v5 = vrot.slane %v272_v4, 4 }
 0x18e   :  { %v274_v13 = vadd.f32 %v273_v5, %v272_v4 }
 0x190   :  { %v219_v7 = vpop.f32.mrf.mxu1  ;;  %v261_v8 = vpop.f32.mrf.mxu2  ;;  %v275_v18 = vrot.slane %v274_v13, 2 }
 0x191   :  { %v291_v11 = vsel %vm124_vm4, %v261_v8, 0.0  ;;  %v279_v21 = vsel %vm124_vm4, %v219_v7, 0.0 }
 0x192   :  { %v292_v12 = vadd.f32 %v291_v11, %v290_v10  ;;  %v276_v25 = vadd.f32 %v275_v18, %v274_v13 }
 0x194   :  { %v293_v15 = vrot.slane %v292_v12, 4  ;;  %v277_v29 = vrot.slane %v276_v25, 1 }
 0x196   :  { %v294_v23 = vadd.f32 %v293_v15, %v292_v12  ;;  %v278_v39 = vadd.f32 %v277_v29, %v276_v25 }
 0x198   :  { %v222_v19 = vpop.f32.mrf.mxu1  ;;  %v264_v20 = vpop.f32.mrf.mxu2  ;;  %v295_v27 = vrot.slane %v294_v23, 2  ;;  %v288_v44 = vmul.f32 0.03125, %v278_v39 }
 0x199   :  { %v280_v22 = vsel %vm124_vm4, %v222_v19, 0.0  ;;  %v299_v32 = vsel %vm124_vm4, %v264_v20, 0.0 }
 0x19a   :  { %v281_v24 = vadd.f32 %v280_v22, %v279_v21  ;;  %v296_v34 = vadd.f32 %v295_v27, %v294_v23  ;;  %v310_v56 = vmul.f32 %v288_v44, %v288_v44  ;;  %v424_v22 = vld [vmem:[%s1301_s1 + $0x1] sm:$0x1]  ;;  %v425_v23 = vadd.f32 1.0, %v423_v16  ;;  %s960_s1 = smov 32  }
 0x19b   :  { %v426_v29 = vadd.f32 1.0, %v424_v22 }
 0x19c   :  { %v282_v26 = vrot.slane %v281_v24, 4  ;;  %v297_v40 = vrot.slane %v296_v34, 1 }
 0x19e   :  { %v283_v28 = vadd.f32 %v282_v26, %v281_v24  ;;  %v298_v46 = vadd.f32 %v297_v40, %v296_v34 }
 0x1a0   :  { %v284_v30 = vrot.slane %v283_v28, 2  ;;  %v267_v31 = vpop.f32.mrf.mxu2  ;;  %v308_v52 = vmul.f32 0.03125, %v298_v46 }
 0x1a1   :  { %v300_v33 = vsel %vm124_vm4, %v267_v31, 0.0 }
 0x1a2   :  { %v285_v35 = vadd.f32 %v284_v30, %v283_v28  ;;  %v301_v36 = vadd.f32 %v300_v33, %v299_v32  ;;  %v312_v59 = vsub.f32 %v308_v52, %v310_v56  ;;  %v444_v56 = vpop.permute.xlu1 %443 }
 0x1a4   :  { %v286_v37 = vrot.slane %v285_v35, 1  ;;  %v302_v38 = vrot.slane %v301_v36, 4 }
 0x1a6   :  { %v303_v41 = vadd.f32 %v302_v38, %v301_v36  ;;  %v287_v42 = vadd.f32 %v286_v37, %v285_v35  ;;  %v417_v36 = vpop.permute.xlu2 %416  ;;  %v429_v37 = vperm.slane %v425_v23, 0 }
 0x1a8   :  { %v304_v43 = vrot.slane %v303_v41, 2  ;;  %v289_v45 = vmul.f32 0.03125, %v287_v42  ;;  %v430_v42 = vperm.slane %v426_v29, 0 }
 0x1aa   :  { %v305_v47 = vadd.f32 %v304_v43, %v303_v41  ;;  %v317_v49 = vsel %vm316_vm7, %v289_v45, %v288_v44  ;;  %v311_v58 = vmul.f32 %v289_v45, %v289_v45 }
 0x1ab   :  { %882 = vmatmul.msk.f32.vlgmr.msra.gmra.mxu3 %vm124_vm4, %v317_v49 }
 0x1ac   :  { %v306_v50 = vrot.slane %v305_v47, 1 }
 0x1ae   :  { %v307_v53 = vadd.f32 %v306_v50, %v305_v47  ;;  %v442_v47 = vpop.permute.xlu0 %441 }
 0x1b0   :  { %v309_v55 = vmul.f32 0.03125, %v307_v53 }
 0x1b2   :  { %v313_v61 = vsub.f32 %v309_v55, %v311_v58  ;;  %v456_v55 = vstv %s451_s14 }
 0x1b4   :  { %v344_v62 = vsel %vm316_vm7, %v313_v61, %v312_v59 }
 0x1b5   :  { %883 = vmatmul.msk.f32.vlgmr.msrb.gmra.mxu3 %vm124_vm4, %v344_v62 }
 0x22e   :  { %v337_v63 = vpop.f32.mrf.mxu3 }
 0x22f   :  { %v341_v11 = vrot.slane %v337_v63, 1  ;;  %v370_v18 = vperm.slane %v337_v63, 0 }
 0x231   :  { %v371_v19 = vperm.slane %v341_v11, 0  ;;  %v374_v26 = vsub.f32 %v1102_v51, %v370_v18  ;;  %v375_v27 = vsub.f32 %v1109_v54, %v370_v18 }
 0x233   :  { %v376_v30 = vsub.f32 %v1116_v57, %v371_v19  ;;  %v377_v32 = vsub.f32 %v1123_v60, %v371_v19 }
 0x238   :  { %v364_v0 = vpop.f32.mrf.mxu3 }
 0x239   :  { %v368_v1 = vrot.slane %v364_v0, 1  ;;  %v378_v2 = vadd.f32 1e-05, %v364_v0 }
 0x23b   :  { %v379_v3 = vadd.f32 1e-05, %v368_v1  ;;  %908 = vrsqrt.f32 %v378_v2  ;;  %vm386_vm9 = vweird.f32 %v378_v2 }
 0x23d   :  { %910 = vrsqrt.f32 %v379_v3  ;;  %vm396_vm12 = vweird.f32 %v379_v3 }
 0x241   :  { %v909_v4 = vpop.eup %908 }
 0x242   :  { %v381_v5 = vmul.f32 %v909_v4, %v378_v2  ;;  %vm387_vm8 = vweird.f32 %v909_v4 }
 0x243   :  { %v911_v7 = vpop.eup %910  ;;  %vm388_vm11 = vmor %vm386_vm9, %vm387_vm8 }
 0x244   :  { %v382_v8 = vmul.f32 %v909_v4, %v381_v5  ;;  %v391_v10 = vmul.f32 %v911_v7, %v379_v3  ;;  %vm397_vm10 = vweird.f32 %v911_v7 }
 0x245   :  { %vm398_vm13 = vmor %vm396_vm12, %vm397_vm10 }
 0x246   :  { %v383_v12 = vmul.f32 0.5, %v382_v8  ;;  %v392_v13 = vmul.f32 %v911_v7, %v391_v10 }
 0x248   :  { %v384_v14 = vsub.f32 1.5, %v383_v12  ;;  %v393_v15 = vmul.f32 0.5, %v392_v13 }
 0x24a   :  { %v385_v20 = vmul.f32 %v909_v4, %v384_v14  ;;  %v394_v21 = vsub.f32 1.5, %v393_v15 }
 0x24c   :  { %v389_v24 = vsel %vm388_vm11, %v909_v4, %v385_v20  ;;  %v395_v25 = vmul.f32 %v911_v7, %v394_v21 }
 0x24d   :  { %v402_v28 = vperm.slane %v389_v24, 0 }
 0x24e   :  { %v399_v31 = vsel %vm398_vm13, %v911_v7, %v395_v25 }
 0x24f   :  { %v403_v33 = vperm.slane %v399_v31, 0  ;;  %v406_v34 = vmul.f32 %v402_v28, %v374_v26  ;;  %v407_v35 = vmul.f32 %v402_v28, %v375_v27  ;;  %v1192_v27 = vperm.slane %v1099_v48, 2 }
 0x251   :  { %v411_v38 = vmul.f32 %v1145_v17, %v406_v34  ;;  %v412_v39 = vmul.f32 %v1145_v17, %v407_v35  ;;  %v408_v40 = vmul.f32 %v403_v33, %v376_v30  ;;  %v409_v41 = vmul.f32 %v403_v33, %v377_v32  ;;  %v535_v30 = vld [vmem:[%s1303_s3 + $0x28] sm:$0xff] }
 0x252   :  { %560 = vmatpush.msra.mxu3 %v535_v30 }
 0x253   :  { %v419_v43 = vadd.f32 %v417_v36, %v411_v38  ;;  %v420_v44 = vadd.f32 %v417_v36, %v412_v39  ;;  %v413_v45 = vmul.f32 %v1145_v17, %v408_v40  ;;  %v414_v46 = vmul.f32 %v1145_v17, %v409_v41 }
 0x254   :  { %561 = vmatpush.msra.mxu3 %v534_v9 }
 0x255   :  { %v433_v49 = vmul.f32 %v429_v37, %v419_v43  ;;  %v434_v50 = vmul.f32 %v429_v37, %v420_v44  ;;  %v421_v52 = vadd.f32 %v417_v36, %v413_v45  ;;  %v422_v53 = vadd.f32 %v417_v36, %v414_v46 }
 0x257   :  { %v447_v58 = vadd.f32 %v442_v47, %v433_v49  ;;  %v448_v59 = vadd.f32 %v442_v47, %v434_v50  ;;  %v435_v61 = vmul.f32 %v430_v42, %v421_v52  ;;  %v436_v62 = vmul.f32 %v430_v42, %v422_v53 }
 0x258   :  { %v536_v50 = vperm.slane %v1099_v48, 3 }
 0x259   :  { %v449_v63 = vadd.f32 %v444_v56, %v435_v61  ;;  %v450_v0 = vadd.f32 %v444_v56, %v436_v62  ;;  %vm453_vm14 = vcmp.gt.f32.partialorder %v448_v59, 0.0  ;;  %v458_v1 = vmul.f32 %v456_v55, %v448_v59 }
 0x25a   :  { %vm452_vm15 = vcmp.gt.f32.partialorder %v447_v58, 0.0  ;;  %v457_v2 = vmul.f32 %v456_v55, %v447_v58 }
 0x25b   :  { %vm454_vm6 = vcmp.gt.f32.partialorder %v449_v63, 0.0  ;;  %vm455_vm8 = vcmp.gt.f32.partialorder %v450_v0, 0.0  ;;  %v459_v17 = vmul.f32 %v456_v55, %v449_v63  ;;  %v460_v3 = vmul.f32 %v456_v55, %v450_v0 }
 0x25c   :  { %v462_v4 = vsel %vm453_vm14, %v448_v59, %v458_v1  ;;  %v461_v5 = vsel %vm452_vm15, %v447_v58, %v457_v2 }
 0x25d   :  { %v463_v7 = vsel %vm454_vm6, %v449_v63, %v459_v17  ;;  %v464_v8 = vsel %vm455_vm8, %v450_v0, %v460_v3  ;;  %495 = vrot.lane.b32.xlu1 %v462_v4, %s958_s0  ;;  %v466_v10 = vrot.slane %v462_v4, 7  ;;  %v478_v11 = vrot.slane %v462_v4, 1  ;;  %493 = vrot.lane.b32.xlu2 %v461_v5, %s958_s0 }
 0x25e   :  { %v468_v12 = vrot.slane %v464_v8, 7  ;;  %v465_v13 = vrot.slane %v461_v5, 7  ;;  %v477_v14 = vrot.slane %v461_v5, 1  ;;  %v479_v15 = vrot.slane %v463_v7, 1 }
 0x25f   :  { %v467_v16 = vrot.slane %v463_v7, 7  ;;  %v480_v19 = vrot.slane %v464_v8, 1 }
 0x260   :  { %v483_v18 = vsel %vm79_vm0, %v477_v14, %v478_v11  ;;  %v472_v20 = vsel %vm62_vm2, %v468_v12, %v465_v13  ;;  %v471_v21 = vsel %vm62_vm2, %v465_v13, %v466_v10  ;;  %v482_v22 = vsel %vm79_vm0, %v478_v11, %v479_v15 }
 0x261   :  { %509 = vrot.lane.b32.xlu0 %v483_v18, %s960_s1  ;;  %v469_v23 = vsel %vm62_vm2, %v467_v16, %v468_v12  ;;  %v470_v24 = vsel %vm62_vm2, %v466_v10, %v467_v16  ;;  %v486_v25 = vsel %vm53_vm1, %v482_v22, 0.0  ;;  %v481_v26 = vsel %vm79_vm0, %v479_v15, %v480_v19 }
 0x262   :  { %v484_v28 = vsel %vm79_vm0, %v480_v19, %v477_v14  ;;  %v473_v32 = vsel %vm50_vm3, %v472_v20, 0.0  ;;  %vm537_vm0 = vcmask 392192   ;;  %v475_v41 = vsel %vm50_vm3, %v470_v24, 0.0 }
 0x263   :  { %v488_v29 = vsel %vm53_vm1, %v484_v28, 0.0  ;;  %vm525_vm1 = vcmask 261120  }
 0x265   :  { %511 = vrot.lane.b32.xlu2 %v486_v25, %s960_s1  ;;  %513 = vrot.lane.b32.xlu1 %v481_v26, %s960_s1 }
 0x269   :  { %497 = vrot.lane.b32.xlu0 %v463_v7, %s958_s0 }
 0x26d   :  { %499 = vrot.lane.b32.xlu2 %v464_v8, %s958_s0  ;;  %810 = vrot.lane.b32.xlu1 %v1192_v27, %s959_s9 }
 0x271   :  { %515 = vrot.lane.b32.xlu0 %v488_v29, %s960_s1 }
 0x275   :  { %831 = vrot.lane.b32.xlu2 %v1102_v51, %s959_s9  ;;  %835 = vrot.lane.b32.xlu1 %v1116_v57, %s959_s9  ;;  %v533_v51 = vld [vmem:[%s1303_s3 + $0x18] sm:$0xff]  ;;  %v531_v57 = vld [vmem:[%s1303_s3 + $0x8] sm:$0xff] }
 0x276   :  { %562 = vmatpush.msra.mxu3 %v533_v51 }
 0x279   :  { %833 = vrot.lane.b32.xlu0 %v1109_v54, %s959_s9  ;;  %v532_v54 = vld [vmem:[%s1303_s3 + $0x10] sm:$0xff] }
 0x27a   :  { %563 = vmatpush.msra.mxu3 %v532_v54 }
 0x27c   :  { %564 = vmatpush.msra.mxu3 %v531_v57 }
 0x27d   :  { %837 = vrot.lane.b32.xlu2 %v1123_v60, %s959_s9  ;;  %v530_v60 = vld [vmem:[%s1303_s3] sm:$0xff]  ;;  %s898_s3 = sld [smem:[#allocation2 + $0x1]] }
 0x27e   :  { %565 = vmatpush.msra.mxu3 %v530_v60 }
 0x2b7   :  { %v494_v31 = vpop.permute.xlu2 %493 }
 0x2b8   :  { %v521_v33 = vsel %vm129_vm5, %v473_v32, %v494_v31 }
 0x2bf   :  { %v512_v38 = vpop.permute.xlu2 %511 }
 0x2c7   :  { %v500_v45 = vpop.permute.xlu2 %499 }
 0x2c8   :  { %v524_v47 = vsel %vm129_vm5, %v469_v23, %v500_v45 }
 0x2cf   :  { %v496_v36 = vpop.permute.xlu1 %495 }
 0x2d0   :  { %v522_v37 = vsel %vm129_vm5, %v471_v21, %v496_v36 }
 0x2d1   :  { %v527_v39 = vsel %vm525_vm1, %v522_v37, %v512_v38 }
 0x2d3   :  { %v510_v34 = vpop.permute.xlu0 %509 }
 0x2d4   :  { %v526_v35 = vsel %vm525_vm1, %v521_v33, %v510_v34 }
 0x2d5   :  { %884 = vmatmul.msk.f32.vlgmr.msra.gmra.mxu3 %vm537_vm0, %v526_v35 }
 0x2d7   :  { %v514_v43 = vpop.permute.xlu1 %513 }
 0x2db   :  { %v498_v40 = vpop.permute.xlu0 %497 }
 0x2dc   :  { %v523_v42 = vsel %vm129_vm5, %v475_v41, %v498_v40 }
 0x2dd   :  { %885 = vmatmul.msk.f32.gmra.mxu3 %vm537_vm0, %v527_v39  ;;  %v528_v44 = vsel %vm525_vm1, %v523_v42, %v514_v43 }
 0x2e3   :  { %v516_v46 = vpop.permute.xlu0 %515 }
 0x2e4   :  { %v529_v49 = vsel %vm525_vm1, %v524_v47, %v516_v46 }
 0x2e5   :  { %886 = vmatmul.msk.f32.gmra.mxu3 %vm537_vm0, %v528_v44 }
 0x2ed   :  { %887 = vmatmul.msk.f32.gmra.mxu3 %vm537_vm0, %v529_v49 }
 0x358   :  { %v567_v52 = vpop.f32.mrf.mxu3 }
 0x359   :  { %v1244_v6 = vadd.f32 %v567_v52, %v536_v50 }
 0x35b   :  { %v620_v53 = vmul.f32 %v1244_v6, %v1244_v6  ;;  %888 = vmatmul.msk.f32.vlgmr.msrb.gmra.mxu1 %vm129_vm5, %v1244_v6 }
 0x35d   :  { %892 = vmatmul.msk.f32.vlgmr.msrb.gmra.mxu2 %vm129_vm5, %v620_v53 }
 0x360   :  { %v570_v55 = vpop.f32.mrf.mxu3 }
 0x361   :  { %v1251_v56 = vadd.f32 %v570_v55, %v536_v50 }
 0x363   :  { %889 = vmatmul.msk.f32.gmra.mxu1 %vm129_vm5, %v1251_v56  ;;  %v621_v48 = vmul.f32 %v1251_v56, %v1251_v56 }
 0x365   :  { %893 = vmatmul.msk.f32.gmra.mxu2 %vm129_vm5, %v621_v48 }
 0x368   :  { %v573_v58 = vpop.f32.mrf.mxu3 }
 0x369   :  { %v1258_v59 = vadd.f32 %v573_v58, %v536_v50 }
 0x36b   :  { %890 = vmatmul.msk.f32.gmra.mxu1 %vm129_vm5, %v1258_v59  ;;  %v622_v61 = vmul.f32 %v1258_v59, %v1258_v59 }
 0x36d   :  { %894 = vmatmul.msk.f32.gmra.mxu2 %vm129_vm5, %v622_v61 }
 0x370   :  { %v576_v62 = vpop.f32.mrf.mxu3 }
 0x371   :  { %v1265_v63 = vadd.f32 %v576_v62, %v536_v50 }
 0x373   :  { %891 = vmatmul.msk.f32.gmra.mxu1 %vm129_vm5, %v1265_v63  ;;  %v623_v0 = vmul.f32 %v1265_v63, %v1265_v63 }
 0x375   :  { %895 = vmatmul.msk.f32.gmra.mxu2 %vm129_vm5, %v623_v0 }
 0x3d8   :  { %v608_v1 = vpop.f32.mrf.mxu1 }
 0x3d9   :  { %v665_v4 = vsel %vm124_vm4, %v608_v1, 0.0 }
 0x3e0   :  { %v611_v2 = vpop.f32.mrf.mxu1  ;;  %v653_v17 = vpop.f32.mrf.mxu2 }
 0x3e1   :  { %v666_v3 = vsel %vm124_vm4, %v611_v2, 0.0  ;;  %v685_v11 = vsel %vm124_vm4, %v653_v17, 0.0 }
 0x3e2   :  { %v667_v5 = vadd.f32 %v666_v3, %v665_v4 }
 0x3e4   :  { %v668_v7 = vrot.slane %v667_v5, 4 }
 0x3e6   :  { %v669_v14 = vadd.f32 %v668_v7, %v667_v5 }
 0x3e8   :  { %v614_v8 = vpop.f32.mrf.mxu1  ;;  %v656_v10 = vpop.f32.mrf.mxu2  ;;  %v670_v16 = vrot.slane %v669_v14, 2 }
 0x3e9   :  { %v686_v12 = vsel %vm124_vm4, %v656_v10, 0.0  ;;  %v674_v20 = vsel %vm124_vm4, %v614_v8, 0.0 }
 0x3ea   :  { %v687_v13 = vadd.f32 %v686_v12, %v685_v11  ;;  %v671_v24 = vadd.f32 %v670_v16, %v669_v14 }
 0x3ec   :  { %v688_v15 = vrot.slane %v687_v13, 4  ;;  %v672_v29 = vrot.slane %v671_v24, 1 }
 0x3ee   :  { %v689_v22 = vadd.f32 %v688_v15, %v687_v13  ;;  %v673_v32 = vadd.f32 %v672_v29, %v671_v24  ;;  %v832_v24 = vpop.permute.xlu2 %831 }
 0x3f0   :  { %v617_v18 = vpop.f32.mrf.mxu1  ;;  %v659_v19 = vpop.f32.mrf.mxu2  ;;  %v690_v26 = vrot.slane %v689_v22, 2  ;;  %v683_v39 = vmul.f32 0.03125, %v673_v32 }
 0x3f1   :  { %v675_v21 = vsel %vm124_vm4, %v617_v18, 0.0  ;;  %v694_v51 = vsel %vm124_vm4, %v659_v19, 0.0 }
 0x3f2   :  { %v676_v23 = vadd.f32 %v675_v21, %v674_v20  ;;  %v691_v57 = vadd.f32 %v690_v26, %v689_v22  ;;  %v705_v49 = vmul.f32 %v683_v39, %v683_v39 }
 0x3f4   :  { %v677_v25 = vrot.slane %v676_v23, 4  ;;  %v692_v35 = vrot.slane %v691_v57, 1 }
 0x3f6   :  { %v678_v28 = vadd.f32 %v677_v25, %v676_v23  ;;  %v693_v41 = vadd.f32 %v692_v35, %v691_v57  ;;  %v811_v25 = vpop.permute.xlu1 %810  ;;  %v822_v57 = vstv %s898_s3 }
 0x3f8   :  { %v679_v30 = vrot.slane %v678_v28, 2  ;;  %v662_v9 = vpop.f32.mrf.mxu2  ;;  %v703_v45 = vmul.f32 0.03125, %v693_v41 }
 0x3f9   :  { %v695_v54 = vsel %vm124_vm4, %v662_v9, 0.0 }
 0x3fa   :  { %v680_v60 = vadd.f32 %v679_v30, %v678_v28  ;;  %v696_v31 = vadd.f32 %v695_v54, %v694_v51  ;;  %v707_v52 = vsub.f32 %v703_v45, %v705_v49 }
 0x3fc   :  { %v681_v33 = vrot.slane %v680_v60, 1  ;;  %v697_v34 = vrot.slane %v696_v31, 4 }
 0x3fe   :  { %v682_v36 = vadd.f32 %v681_v33, %v680_v60  ;;  %v698_v37 = vadd.f32 %v697_v34, %v696_v31  ;;  %v836_v41 = vpop.permute.xlu1 %835 }
 0x400   :  { %v699_v38 = vrot.slane %v698_v37, 2  ;;  %v684_v40 = vmul.f32 0.03125, %v682_v36 }
 0x402   :  { %v700_v42 = vadd.f32 %v699_v38, %v698_v37  ;;  %v711_v43 = vsel %vm316_vm7, %v684_v40, %v683_v39  ;;  %v706_v50 = vmul.f32 %v684_v40, %v684_v40  ;;  %v834_v37 = vpop.permute.xlu0 %833  ;;  %v838_v40 = vpop.permute.xlu2 %837 }
 0x403   :  { %896 = vmatmul.msk.f32.vlgmr.msrb.gmra.mxu0 %vm124_vm4, %v711_v43 }
 0x404   :  { %v701_v44 = vrot.slane %v700_v42, 1 }
 0x406   :  { %v702_v46 = vadd.f32 %v701_v44, %v700_v42 }
 0x408   :  { %v704_v47 = vmul.f32 0.03125, %v702_v46 }
 0x40a   :  { %v708_v53 = vsub.f32 %v704_v47, %v706_v50 }
 0x40c   :  { %v738_v55 = vsel %vm316_vm7, %v708_v53, %v707_v52 }
 0x40d   :  { %897 = vmatmul.msk.f32.vlgmr.msra.gmra.mxu0 %vm124_vm4, %v738_v55 }
 0x480   :  { %v731_v48 = vpop.f32.mrf.mxu0 }
 0x481   :  { %v735_v5 = vrot.slane %v731_v48, 1  ;;  %v764_v12 = vperm.slane %v731_v48, 0 }
 0x483   :  { %v765_v13 = vperm.slane %v735_v5, 0  ;;  %v768_v19 = vsub.f32 %v1244_v6, %v764_v12  ;;  %v769_v20 = vsub.f32 %v1251_v56, %v764_v12 }
 0x485   :  { %v770_v22 = vsub.f32 %v1258_v59, %v765_v13  ;;  %v771_v26 = vsub.f32 %v1265_v63, %v765_v13 }
 0x48a   :  { %v758_v58 = vpop.f32.mrf.mxu0 }
 0x48b   :  { %v762_v61 = vrot.slane %v758_v58, 1  ;;  %v772_v62 = vadd.f32 1e-05, %v758_v58 }
 0x48d   :  { %v773_v0 = vadd.f32 1e-05, %v762_v61  ;;  %912 = vrsqrt.f32 %v772_v62  ;;  %vm780_vm3 = vweird.f32 %v772_v62 }
 0x48f   :  { %914 = vrsqrt.f32 %v773_v0  ;;  %vm790_vm9 = vweird.f32 %v773_v0 }
 0x493   :  { %v913_v1 = vpop.eup %912 }
 0x494   :  { %v775_v2 = vmul.f32 %v913_v1, %v772_v62  ;;  %vm781_vm2 = vweird.f32 %v913_v1 }
 0x495   :  { %v915_v17 = vpop.eup %914  ;;  %vm782_vm7 = vmor %vm780_vm3, %vm781_vm2 }
 0x496   :  { %v776_v3 = vmul.f32 %v913_v1, %v775_v2  ;;  %v785_v4 = vmul.f32 %v915_v17, %v773_v0  ;;  %vm791_vm4 = vweird.f32 %v915_v17 }
 0x497   :  { %vm792_vm10 = vmor %vm790_vm9, %vm791_vm4 }
 0x498   :  { %v777_v7 = vmul.f32 0.5, %v776_v3  ;;  %v786_v8 = vmul.f32 %v915_v17, %v785_v4 }
 0x49a   :  { %v778_v10 = vsub.f32 1.5, %v777_v7  ;;  %v787_v11 = vmul.f32 0.5, %v786_v8 }
 0x49c   :  { %v779_v14 = vmul.f32 %v913_v1, %v778_v10  ;;  %v788_v15 = vsub.f32 1.5, %v787_v11 }
 0x49e   :  { %v783_v16 = vsel %vm782_vm7, %v913_v1, %v779_v14  ;;  %v789_v18 = vmul.f32 %v915_v17, %v788_v15 }
 0x49f   :  { %v796_v21 = vperm.slane %v783_v16, 0 }
 0x4a0   :  { %v793_v23 = vsel %vm792_vm10, %v915_v17, %v789_v18 }
 0x4a1   :  { %v797_v28 = vperm.slane %v793_v23, 0  ;;  %v800_v29 = vmul.f32 %v796_v21, %v768_v19  ;;  %v801_v30 = vmul.f32 %v796_v21, %v769_v20 }
 0x4a3   :  { %v802_v9 = vmul.f32 %v797_v28, %v770_v22  ;;  %v803_v51 = vmul.f32 %v797_v28, %v771_v26  ;;  %v805_v54 = vmul.f32 %v1192_v27, %v800_v29  ;;  %v806_v6 = vmul.f32 %v1192_v27, %v801_v30 }
 0x4a5   :  { %v807_v56 = vmul.f32 %v1192_v27, %v802_v9  ;;  %v808_v60 = vmul.f32 %v1192_v27, %v803_v51  ;;  %v813_v59 = vadd.f32 %v811_v25, %v805_v54  ;;  %v814_v31 = vadd.f32 %v811_v25, %v806_v6 }
 0x4a7   :  { %v815_v32 = vadd.f32 %v811_v25, %v807_v56  ;;  %v816_v33 = vadd.f32 %v811_v25, %v808_v60  ;;  %vm818_vm11 = vcmp.gt.f32.partialorder %v813_v59, 0.0  ;;  %vm819_vm12 = vcmp.gt.f32.partialorder %v814_v31, 0.0 }
 0x4a8   :  { %v823_v63 = vmul.f32 %v822_v57, %v813_v59  ;;  %v824_v34 = vmul.f32 %v822_v57, %v814_v31 }
 0x4a9   :  { %vm820_vm13 = vcmp.gt.f32.partialorder %v815_v32, 0.0  ;;  %vm821_vm14 = vcmp.gt.f32.partialorder %v816_v33, 0.0  ;;  %v825_v35 = vmul.f32 %v822_v57, %v815_v32  ;;  %v826_v36 = vmul.f32 %v822_v57, %v816_v33 }
 0x4aa   :  { %v827_v38 = vsel %vm818_vm11, %v813_v59, %v823_v63  ;;  %v828_v39 = vsel %vm819_vm12, %v814_v31, %v824_v34 }
 0x4ab   :  { %v829_v27 = vsel %vm820_vm13, %v815_v32, %v825_v35  ;;  %v830_v42 = vsel %vm821_vm14, %v816_v33, %v826_v36  ;;  %v843_v43 = vadd.f32 %v832_v24, %v827_v38  ;;  %v844_v44 = vadd.f32 %v834_v37, %v828_v39 }
 0x4ac   :  { %v845_v45 = vadd.f32 %v836_v41, %v829_v27  ;;  %v846_v46 = vadd.f32 %v838_v40, %v830_v42 }
 0x4ad   :  { %847 = vst.msk [vmem:[#allocation5] sm:$0xff] %vm129_vm5, %v843_v43 }
 0x4ae   :  { %848 = vst.msk [vmem:[#allocation5 + $0x8] sm:$0xff] %vm129_vm5, %v844_v44 }
 0x4af   :  { %849 = vst.msk [vmem:[#allocation5 + $0x10] sm:$0xff] %vm129_vm5, %v845_v45 }
 0x4b0   :  { %850 = vst.msk [vmem:[#allocation5 + $0x18] sm:$0xff] %vm129_vm5, %v846_v46 }
 0x4b1   :  { %863 = dma.vmem_to_hbm [thread:$0]  %s856_s26, 512, %s858_s5, [#allocation3], %s962_s28, %s962_s28, %s957_s7  }
 0x4b2   :  { %954 = dma.done.wait [#allocation3], 512  }
 0x4b3   :  { %955 = vsyncadd [#allocation3], 4294966784 }
 0x4b4   :  { %868 = vsyncpa [#allocation3], 1 }
 0x4b5   :  { %869 = vsyncpa [#allocation4], 1 }

</bundles_post_ra>
